<compile_context>
chip_gen: v6e
topology: v6e:2x2x1
jax: 0.10.0
libtpu: 0.0.40
codegen_flags: <defaults>
</compile_context>

<pallas_src>
import math
import functools

import jax
import jax.numpy as jnp
from jax.experimental import pallas as pl
from jax.experimental.pallas import tpu as pltpu


# --------------------------------------------------------------------------
# Kernels (elementwise; rely on numpy broadcasting so the same body works for
# squeezed (TS, D) blocks and (TB, TS, D) blocks).
# --------------------------------------------------------------------------
def _pe_eval_kernel(x_ref, pe_ref, o_ref):
    o_ref[...] = (x_ref[...] + pe_ref[...]).astype(o_ref.dtype)


def _pe_train_kernel(x_ref, pe_ref, bits_ref, o_ref, *, threshold, scale):
    y = x_ref[...] + pe_ref[...]
    # Integer-threshold Bernoulli: keep with prob (1 - p). bits are int32 with
    # the low 24 bits uniform, so the masked value is non-negative.
    keep = (bits_ref[...] & 0x00FFFFFF) >= threshold
    o_ref[...] = jnp.where(keep, y * scale, 0.0).astype(o_ref.dtype)


# --------------------------------------------------------------------------
# Parameter setup (plain JAX glue): sinusoidal table, same as torch __init__.
# --------------------------------------------------------------------------
def make_pe_table(d_model, max_len=5000, dtype=jnp.float32):
    position = jnp.arange(0.0, max_len, dtype=jnp.float32)[:, None]           # (L, 1)
    div_term = jnp.exp(
        jnp.arange(0.0, d_model, 2, dtype=jnp.float32)
        * (-(math.log(10000.0) / d_model))
    )                                                                          # (D/2,)
    pe = jnp.zeros((max_len, d_model), dtype=jnp.float32)
    pe = pe.at[:, 0::2].set(jnp.sin(position * div_term))
    pe = pe.at[:, 1::2].set(jnp.cos(position * div_term))
    return pe.astype(dtype)                                                    # (L, D)


# --------------------------------------------------------------------------
# Tile selection: ~2 MiB per pipeline buffer, (8, 128)-rule compliant.
# --------------------------------------------------------------------------
_TARGET_BLOCK_BYTES = 2 << 20  # ~2 MiB per buffer


def _choose_tiles(B, S, D, itemsize, target_bytes):
    row_bytes = D * itemsize
    if S % 8 != 0:
        # sublane dim of the block must be a multiple of 8 OR the full dim
        ts = S
    else:
        ts = min(S, max(8, (target_bytes // max(1, row_bytes)) // 8 * 8))
    # Tiny problem: fold the whole batch into one block -> single grid step.
    tb = B if B * S * row_bytes <= target_bytes else 1
    return tb, ts


# --------------------------------------------------------------------------
# Wrapper.
# --------------------------------------------------------------------------
def positional_encoding_forward(x, pe_table, *, p=0.1, training=False,
                                rng_key=None, donate_x=False,
                                block_bytes=_TARGET_BLOCK_BYTES):
    """out = dropout(x + pe_table[:S]) for x of shape (B, S, D)."""
    B, S, D = x.shape
    L, D_pe = pe_table.shape
    assert D_pe == D and L >= S, "pe_table must be (max_len >= S, d_model)"

    # One-time cast so the kernel computes in the input dtype (no per-tile
    # upcast). Ideally the table is already built in x.dtype (then this is a
    # no-op).
    if pe_table.dtype != x.dtype:
        pe_table = pe_table.astype(x.dtype)

    tb, ts = _choose_tiles(B, S, D, x.dtype.itemsize, block_bytes)
    # Batch is the innermost grid axis -> the PE block index only depends on
    # the outer axis, so Pallas keeps the PE tile resident across batch steps.
    grid = (pl.cdiv(S, ts), pl.cdiv(B, tb))

    b_dim = pl.Squeezed() if tb == 1 else tb
    x_spec = pl.BlockSpec((b_dim, ts, D), lambda s, b: (b, s, 0))
    out_spec = pl.BlockSpec((b_dim, ts, D), lambda s, b: (b, s, 0))
    # Full pe_table is passed; the index_map picks the rows (no wrapper slice).
    pe_spec = pl.BlockSpec((ts, D), lambda s, b: (s, 0))

    compiler_params = pltpu.CompilerParams(
        dimension_semantics=("parallel", "parallel"),
    )
    io_alias = {0: 0} if donate_x else {}

    if training and p > 0.0:
        # TODO(synk): on a TPU-only deployment, in-kernel pltpu.prng_* bits
        # would avoid streaming B*S*D extra words from HBM; kept host-side
        # (jax.random) so the kernel also runs under CPU/interpret mode.
        if rng_key is None:
            rng_key = jax.random.PRNGKey(0)
        bits = jax.lax.bitcast_convert_type(
            jax.random.bits(rng_key, (B, S, D), dtype=jnp.uint32), jnp.int32)
        threshold = int(round(float(p) * (1 << 24)))
        scale = 1.0 / (1.0 - float(p)) if p < 1.0 else 0.0
        kernel = functools.partial(_pe_train_kernel,
                                   threshold=threshold, scale=scale)
        bits_spec = pl.BlockSpec((b_dim, ts, D), lambda s, b: (b, s, 0))
        in_specs = [x_spec, pe_spec, bits_spec]
        args = (x, pe_table, bits)
    else:
        kernel = _pe_eval_kernel
        in_specs = [x_spec, pe_spec]
        args = (x, pe_table)

    return pl.pallas_call(
        kernel,
        out_shape=jax.ShapeDtypeStruct((B, S, D), x.dtype),
        grid=grid,
        in_specs=in_specs,
        out_specs=out_spec,
        input_output_aliases=io_alias,
        compiler_params=compiler_params,
    )(*args)


# --------------------------------------------------------------------------
if __name__ == "__main__":
    # Small shapes consistent with the module: batch=2, seq=8, d_model=32.
    B, S, D = 2, 8, 32
    dropout_p = 0.1
    max_len = 64

    key = jax.random.PRNGKey(0)
    x = jax.random.normal(key, (B, S, D), dtype=jnp.float32)
    pe_table = make_pe_table(D, max_len=max_len, dtype=x.dtype)

    # Eval mode: dropout is identity -> exact reference comparison.
    out = positional_encoding_forward(x, pe_table, p=dropout_p, training=False)
    out = jax.block_until_ready(out)
    ref = x + pe_table[None, :S, :]
    assert out.shape == (B, S, D)
    assert jnp.allclose(out, ref, atol=1e-6, rtol=1e-6), "eval mismatch vs reference"

    # Training mode: statistically-equivalent inverted dropout (not bit-identical
    # to torch's RNG stream). Every nonzero element must equal ref / (1 - p).
    out_train = positional_encoding_forward(
        x, pe_table, p=dropout_p, training=True, rng_key=jax.random.PRNGKey(1234))
    out_train = jax.block_until_ready(out_train)
    assert out_train.shape == (B, S, D)
    ok = jnp.where(out_train == 0.0, True,
                   jnp.abs(out_train * (1.0 - dropout_p) - ref) < 1e-5)
    assert bool(jnp.all(ok)), "training-mode dropout values inconsistent"

    # Exercise the tiled path (squeezed batch dim, multi-step grid with the PE
    # tile resident across the inner batch axis) at a modest size by forcing
    # small blocks.
    B2, S2, D2 = 2, 256, 128
    x2 = jax.random.normal(jax.random.PRNGKey(2), (B2, S2, D2), dtype=jnp.float32)
    pe2 = make_pe_table(D2, max_len=512, dtype=x2.dtype)
    out2 = positional_encoding_forward(x2, pe2, p=dropout_p, training=False,
                                       block_bytes=8 * 128 * 4)
    out2 = jax.block_until_ready(out2)
    ref2 = x2 + pe2[None, :S2, :]
    assert jnp.allclose(out2, ref2, atol=1e-6, rtol=1e-6), "tiled-path mismatch"

    print("KERNEL_OK")
</pallas_src>

<mosaic_0001>
module attributes {stable_mosaic.version = 11 : i64} {
  func.func @_pe_eval_kernel(%arg0: i32, %arg1: i32, %arg2: memref<2x8x32xf32, #tpu.memory_space<vmem>>, %arg3: memref<8x32xf32, #tpu.memory_space<vmem>>, %arg4: memref<2x8x32xf32, #tpu.memory_space<vmem>>) attributes {dimension_semantics = [#tpu.dimension_semantics<parallel>, #tpu.dimension_semantics<parallel>], iteration_bounds = array<i64: 1, 1>, scalar_prefetch = 0 : i64, scratch_operands = 0 : i64, tpu.core_type = #tpu.core_type<tc>, window_params = [{transform_indices = @transform_0, window_bounds = array<i64: 2, 8, 32>}, {transform_indices = @transform_1, window_bounds = array<i64: 8, 32>}, {transform_indices = @transform_2, window_bounds = array<i64: 2, 8, 32>}]} {
    %c0 = arith.constant 0 : index
    %c0_0 = arith.constant 0 : index
    %c0_1 = arith.constant 0 : index
    %0 = vector.load %arg2[%c0, %c0_0, %c0_1] : memref<2x8x32xf32, #tpu.memory_space<vmem>>, vector<2x8x32xf32>
    %c0_2 = arith.constant 0 : index
    %c0_3 = arith.constant 0 : index
    %1 = vector.load %arg3[%c0_2, %c0_3] : memref<8x32xf32, #tpu.memory_space<vmem>>, vector<8x32xf32>
    %2 = vector.shape_cast %1 : vector<8x32xf32> to vector<1x8x32xf32>
    %3 = vector.broadcast %2 : vector<1x8x32xf32> to vector<2x8x32xf32>
    %4 = arith.addf %0, %3 : vector<2x8x32xf32>
    %c0_4 = arith.constant 0 : index
    %c0_5 = arith.constant 0 : index
    %c0_6 = arith.constant 0 : index
    %5 = vector.load %arg4[%c0_4, %c0_5, %c0_6] : memref<2x8x32xf32, #tpu.memory_space<vmem>>, vector<2x8x32xf32>
    tpu.vector_store %arg4[%c0_4, %c0_5, %c0_6], %4 {strides = array<i32>} : memref<2x8x32xf32, #tpu.memory_space<vmem>>, vector<2x8x32xf32>,
    return
  }
  func.func @transform_0(%arg0: i32, %arg1: i32) -> (i32, i32, i32) {
    %c0_i32 = arith.constant 0 : i32
    %c0_i32_0 = arith.constant 0 : i32
    return %arg1, %arg0, %c0_i32 : i32, i32, i32
  }
  func.func @transform_1(%arg0: i32, %arg1: i32) -> (i32, i32) {
    %c0_i32 = arith.constant 0 : i32
    %c0_i32_0 = arith.constant 0 : i32
    return %arg0, %c0_i32 : i32, i32
  }
  func.func @transform_2(%arg0: i32, %arg1: i32) -> (i32, i32, i32) {
    %c0_i32 = arith.constant 0 : i32
    %c0_i32_0 = arith.constant 0 : i32
    return %arg1, %arg0, %c0_i32 : i32, i32, i32
  }
}

</mosaic_0001>

<bundles_post_ra>
// kernel: tpu_custom_call.1
= control target key start
LH: loop header
LB: loop body
LE: loop exit
PB: predicated region body
PF: predicated region fallthrough
CT: control target
= control target key end

     0   :  { %vm17_vm0 = vcmask 261120   ;;  %s91_s0 = inlined_call_operand.vmem [shape: f32[2,8,32], index: 0, kind: input, shape index: {}]   ;;  %s92_s1 = inlined_call_operand.vmem [shape: f32[64,32], index: 1, kind: input, shape index: {}]   ;;  %s93_s2 = inlined_call_operand.hbm [shape: f32[2,8,32], index: 2, kind: output, shape index: {}]  }
   0x1   :  { %v12_v0 = vld [vmem:[%s91_s0] sm:$0xff]  ;;  %v13_v2 = vld [vmem:[%s91_s0 + $0x8] sm:$0xff] }
   0x2   :  { %v14_v1 = vld [vmem:[%s92_s1] sm:$0xff] }
   0x3   :  { %v15_v3 = vadd.f32 %v14_v1, %v12_v0  ;;  %v16_v4 = vadd.f32 %v14_v1, %v13_v2 }
   0x4   :  { %7 = vsyncpa [#allocation3], 0  ;;  %s61_s15 = smov [#allocation2]  }
   0x5   :  { %s25_s16 = sshll.u32 %s61_s15, 4  ;;  %18 = vst.msk [vmem:[#allocation2] sm:$0xff] %vm17_vm0, %v15_v3  ;;  %19 = vst.msk [vmem:[#allocation2 + $0x8] sm:$0xff] %vm17_vm0, %v16_v4  ;;  %s26_s16 = int_to_ptr.vmem [resolvable:$true] %s25_s16 }
   0x6   :  { %s39_s17 = scalar_lea.vmem %s26_s16, 256  ;;  %p44_p1 = scmp.lt.s32.totalorder %s26_s16, %s26_s16 }
   0x7   :  { %p40_p0 = scmp.ne.s32.totalorder %s26_s16, %s39_s17  ;;  %p45_p2 = scmp.lt.s32.totalorder %s39_s17, %s39_s17 }
   0x9   :  { %p46_p3 = por %p45_p2, %p44_p1 }
   0xb   :  { %p47_p4 = pnand %p46_p3, %p40_p0 }
   0xd   :  { %50 = shalt.err (!%p47_p4)
}
   0xe   :  { %s62_s1 = smov 128   ;;  %s63_s18 = smov 8  }
   0xf   :  { %31 = dma.vmem_to_hbm [thread:$0]  %s26_s16, 256, %s93_s2, [#allocation3], %s62_s1, %s62_s1, %s63_s18  }
  0x10   :  { %59 = dma.done.wait [#allocation3], 256  }
  0x11   :  { %60 = vsyncadd [#allocation3], 4294967040 }
  0x12   :  { %35 = vsyncpa [#allocation3], 1 }

</bundles_post_ra>
